<compile_context>
chip_gen: v6e
topology: v6e:2x2x1
jax: 0.10.0
libtpu: 0.0.40
codegen_flags: <defaults>
</compile_context>

<pallas_src>
import jax
import jax.numpy as jnp
from jax.experimental import pallas as pl
from jax.experimental.pallas import tpu as pltpu

_LANE = 128                    # lane width: tiled last-dim must be a multiple
_MAX_TL = 1024                 # cap on the L tile (amortizes per-step overhead)
_BLOCK_BUDGET = 2 * 1024 * 1024  # ~2 MiB per block buffer (x/out double-buffered)


def _spatial_dropout_kernel(mask_ref, x_ref, o_ref):
    # mask_ref: (1, C, 1)   -- per-(sample, channel) scale: 0 or 1/keep_prob
    # x_ref/o_ref: (1, C, TL)
    # Single lane-broadcast + elementwise multiply per block (VPU only).
    o_ref[...] = x_ref[...] * mask_ref[...]


def spatial_dropout(x, seed, dropout_rate, training=True):
    """JAX/Pallas equivalent of SpatialDropout.forward (training mode).

    x: (N, C, L). Whole (n, c) channels are zeroed with prob dropout_rate and
    survivors are scaled by 1/(1 - dropout_rate) -- i.e. Dropout2d applied to
    x.unsqueeze(-1) and squeezed back.
    """
    if dropout_rate <= 0 or not training:
        return x
    keep_prob = 1.0 - float(dropout_rate)

    N, C, L = x.shape

    # --- per-(N, C) mask, generated ONCE outside the kernel -----------------
    key = jax.random.PRNGKey(seed)
    keep = jax.random.bernoulli(key, p=keep_prob, shape=(N, C))
    scale = jnp.asarray(1.0 / keep_prob, dtype=x.dtype)  # mask stays in x dtype
    mask = (keep.astype(x.dtype) * scale).reshape(N, C, 1)

    # --- choose L tile -------------------------------------------------------
    itemsize = jnp.dtype(x.dtype).itemsize
    if C * L * itemsize <= _BLOCK_BUDGET:
        # One block covers the full L extent of a sample: legal regardless of
        # divisibility (block dim == full array dim) and avoids any padding.
        TL = L
    else:
        # Lane-dense multiple-of-128 tile, sized so (C, TL) stays in budget.
        tl_cap = max(_LANE, (_BLOCK_BUDGET // (C * itemsize)) // _LANE * _LANE)
        TL = min(_MAX_TL, tl_cap)
        # TODO(synk): for extremely large C (C*128*itemsize > VMEM budget) a
        # second grid axis tiling C would be needed; not expected for resnet1d.

    grid = (N, pl.cdiv(L, TL))

    out = pl.pallas_call(
        _spatial_dropout_kernel,
        out_shape=jax.ShapeDtypeStruct((N, C, L), x.dtype),
        grid=grid,
        in_specs=[
            pl.BlockSpec((1, C, 1), lambda n, l: (n, 0, 0)),    # mask (reused per L tile)
            pl.BlockSpec((1, C, TL), lambda n, l: (n, 0, l)),   # x tile
        ],
        out_specs=pl.BlockSpec((1, C, TL), lambda n, l: (n, 0, l)),
        compiler_params=pltpu.CompilerParams(
            dimension_semantics=("parallel", "parallel")),
    )(mask, x)

    return out


if __name__ == "__main__":
    key = jax.random.PRNGKey(0)
    N, C, L = 2, 4, 16
    dropout_rate = 0.5

    x = jax.random.normal(key, (N, C, L), dtype=jnp.float32)

    out = spatial_dropout(x, seed=1234, dropout_rate=dropout_rate)
    out = jax.block_until_ready(out)

    # Sanity checks: each (n, c) channel is either entirely zeroed or equal
    # to x / keep_prob (i.e. the mask is constant along L).
    keep_prob = 1.0 - dropout_rate
    x_np, out_np = jax.device_get(x), jax.device_get(out)
    ok = True
    for n in range(N):
        for c in range(C):
            chan = out_np[n, c]
            if abs(chan).max() == 0.0:
                continue  # dropped channel
            expected = x_np[n, c] / keep_prob
            if not jnp.allclose(chan, expected, rtol=1e-5, atol=1e-5):
                ok = False
    assert ok, "spatial dropout mask not constant per channel"
    assert out.shape == x.shape and out.dtype == x.dtype

    # dropout_rate <= 0 path: identity
    out_id = spatial_dropout(x, seed=1234, dropout_rate=0.0)
    assert jnp.array_equal(out_id, x)

    # eval-mode path: identity
    out_eval = spatial_dropout(x, seed=1234, dropout_rate=dropout_rate,
                               training=False)
    assert jnp.array_equal(out_eval, x)

    print("KERNEL_OK")
</pallas_src>

<mosaic_0001>
module attributes {stable_mosaic.version = 11 : i64} {
  func.func @_spatial_dropout_kernel(%arg0: i32, %arg1: i32, %arg2: memref<1x4x1xf32, #tpu.memory_space<vmem>>, %arg3: memref<1x4x16xf32, #tpu.memory_space<vmem>>, %arg4: memref<1x4x16xf32, #tpu.memory_space<vmem>>) attributes {dimension_semantics = [#tpu.dimension_semantics<parallel>, #tpu.dimension_semantics<parallel>], iteration_bounds = array<i64: 2, 1>, scalar_prefetch = 0 : i64, scratch_operands = 0 : i64, tpu.core_type = #tpu.core_type<tc>, window_params = [{transform_indices = @transform_0, window_bounds = array<i64: 1, 4, 1>}, {transform_indices = @transform_1, window_bounds = array<i64: 1, 4, 16>}, {transform_indices = @transform_2, window_bounds = array<i64: 1, 4, 16>}]} {
    %c0 = arith.constant 0 : index
    %c0_0 = arith.constant 0 : index
    %c0_1 = arith.constant 0 : index
    %0 = vector.load %arg3[%c0, %c0_0, %c0_1] : memref<1x4x16xf32, #tpu.memory_space<vmem>>, vector<1x4x16xf32>
    %c0_2 = arith.constant 0 : index
    %c0_3 = arith.constant 0 : index
    %c0_4 = arith.constant 0 : index
    %1 = vector.load %arg2[%c0_2, %c0_3, %c0_4] : memref<1x4x1xf32, #tpu.memory_space<vmem>>, vector<1x4x1xf32>
    %2 = vector.broadcast %1 : vector<1x4x1xf32> to vector<1x4x16xf32>
    %3 = arith.mulf %0, %2 : vector<1x4x16xf32>
    %c0_5 = arith.constant 0 : index
    %c0_6 = arith.constant 0 : index
    %c0_7 = arith.constant 0 : index
    %4 = vector.load %arg4[%c0_5, %c0_6, %c0_7] : memref<1x4x16xf32, #tpu.memory_space<vmem>>, vector<1x4x16xf32>
    tpu.vector_store %arg4[%c0_5, %c0_6, %c0_7], %3 {strides = array<i32>} : memref<1x4x16xf32, #tpu.memory_space<vmem>>, vector<1x4x16xf32>,
    return
  }
  func.func @transform_0(%arg0: i32, %arg1: i32) -> (i32, i32, i32) {
    %c0_i32 = arith.constant 0 : i32
    %c0_i32_0 = arith.constant 0 : i32
    %c0_i32_1 = arith.constant 0 : i32
    return %arg0, %c0_i32, %c0_i32_0 : i32, i32, i32
  }
  func.func @transform_1(%arg0: i32, %arg1: i32) -> (i32, i32, i32) {
    %c0_i32 = arith.constant 0 : i32
    %c0_i32_0 = arith.constant 0 : i32
    return %arg0, %c0_i32, %arg1 : i32, i32, i32
  }
  func.func @transform_2(%arg0: i32, %arg1: i32) -> (i32, i32, i32) {
    %c0_i32 = arith.constant 0 : i32
    %c0_i32_0 = arith.constant 0 : i32
    return %arg0, %c0_i32, %arg1 : i32, i32, i32
  }
}

</mosaic_0001>

<bundles_post_ra>
// kernel: tpu_custom_call.1
= control target key start
LH: loop header
LB: loop body
LE: loop exit
PB: predicated region body
PF: predicated region fallthrough
CT: control target
= control target key end

     0   :  { %7 = vsyncpa [#allocation3], 0  ;;  %s555_s0 = inlined_call_operand.vmem [shape: f32[2,4,1], index: 0, kind: input, shape index: {}]   ;;  %s556_s1 = inlined_call_operand.vmem [shape: f32[2,4,16], index: 1, kind: input, shape index: {}]   ;;  %s557_s2 = inlined_call_operand.hbm [shape: f32[2,4,16], index: 2, kind: output, shape index: {}]  }
   0x1   :  { %9 = vsyncpa [#allocation3 + $0x1], 0  ;;  %s453_s9 = smov 0   ;;  %s455_s10 = smov 0  }
   0x2   :  { %s457_s11 = smov 0   ;;  %s459_s12 = smov 0  }
   0x3   :  { %s461_s13 = smov 0   ;;  %s463_s14 = smov 0  }
   0x4 LB: > { %s289_s15 = sadd.s32 4294967295, %s434_s14   ;;  %s290_s16 = sadd.s32 4294967294, %s434_s14   ;;  %s434_s14 = sphi %s463_s14, %s15_s14   ;;  %s430_s13 = sphi %s461_s13, %s564_s13   ;;  %s426_s12 = sphi %s459_s12, %s563_s12   ;;  %s422_s11 = sphi %s457_s11, %s562_s11   ;;  %s418_s10 = sphi %s455_s10, %s561_s10   ;;  %s414_s9 = sphi %s453_s9, %s560_s9  }
   0x5   : > { %s27_s17 = sadd.s32 1, %s430_s13  ;;  %s90_s18 = sadd.s32 1, %s422_s11 }
   0x6   : > { %p29_p0 = scmp.ge.s32.totalorder %s27_s17, 2  ;;  %p100_p1 = scmp.ne.s32.totalorder %s422_s11, %s418_s10 }
   0x7   : > { %p101_p2 = scmp.eq.s32.totalorder %s289_s15, 1  ;;  %p106_p3 = scmp.ne.s32.totalorder %s418_s10, %s414_s9 }
   0x8   : > { %s566_s17 = smov (%p29_p0, %s27_s17), 0  ;;  %p107_p5 = scmp.eq.s32.totalorder %s290_s16, 1 }
   0x9   : > { %p493_p4 = por %p101_p2, %p100_p1  ;;  %s85_s20 = ssub.s32 %s430_s13, %s566_s17 }
   0xa   : > { %p293_p6 = scmp.ge.s32.totalorder %s434_s14, 1  ;;  %p88_p7 = scmp.eq.s32.totalorder %s85_s20, 0 }
   0xb   : > { %p500_p8 = por %p107_p5, %p106_p3  ;;  %p142_p9 = scmp.lt.s32.totalorder %s434_s14, 3 }
   0xc   : > { %s506_s22 = scalar_select %p88_p7, %s422_s11, %s90_s18  }
   0xd   : > { %p143_p10 = pnand %p293_p6, %p142_p9 }
   0xe   : > { %p170_p11 = scmp.lt.s32.totalorder (!%p143_p10), %s426_s12, 1  ;;  %s167_s28 = sand.u32 (!%p143_p10), 1, %s418_s10  }
   0xf   : > { %146 = sbr.rel (%p143_p10) target bundleno = 164 (0xa4), region = 28  ;;  %s294_s29 = sshll.u32 (!%p143_p10), %s167_s28, 2 }
  0x10   : > { %s298_s5 = sshll.u32 (!%p143_p10), %s426_s12, 6  ;;  %s169_s6 = scalar_lea.vmem (!%p143_p10), [#allocation2], %s294_s29 }
  0x11   : > { %s206_s7 = sshll.u32 (!%p143_p10), %s169_s6, 4  ;;  %s204_s16 = scalar_lea.hbm (!%p143_p10), %s557_s2, %s298_s5  ;;  %s207_s7 = int_to_ptr.vmem [resolvable:$true] %s206_s7 }
  0x12   : > { %s192_s18 = scalar_lea.sflag (!%p143_p10), [#allocation3], %s167_s28  ;;  %s358_s20 = scalar_lea.vmem (!%p143_p10), %s207_s7, 64 }
  0x13   : > { %p359_p12 = scmp.ne.s32.totalorder (!%p143_p10), %s207_s7, %s358_s20 }
  0x14   : > { %v436_v0 = vmov 0   ;;  %s171_s23 = scalar_select %p170_p11, %s426_s12, 1  ;;  %vm189_vm0 = vcmask 125952  }
  0x15   : > { %357 = vset.pattern.permute.xlu0 %v436_v0  ;;  %p360_p13 = pnand %p359_p12, %p493_p4 }
  0x16   : > { %s295_s24 = sshll.u32 %s171_s23, 2  ;;  %s437_s23 = smov [#allocation2]  }
  0x17   : > { %s173_s27 = scalar_lea.vmem %s555_s0, %s295_s24  ;;  %s180_s4 = scalar_lea.vmem %s556_s1, %s295_s24 }
  0x18   : > { %v182_v1 = vld [vmem:[%s173_s27] sm:$0xf]  ;;  %p361_p0 = pneg %p360_p13  ;;  %s362_s24 = sshll.u32 %s437_s23, 4  ;;  %s363_s24 = int_to_ptr.vmem [resolvable:$false] %s362_s24 }
  0x19   : > { %185 = vperm.xlu0 %357, %v182_v1   ;;  %v181_v2 = vld [vmem:[%s180_s4] sm:$0xf]  ;;  %s364_s12 = scalar_lea.vmem %s363_s24, 128  ;;  %p365_p1 = scmp.lt.s32.totalorder %s207_s7, %s363_s24 }
  0x1a   : > { %p366_p2 = scmp.lt.s32.totalorder %s364_s12, %s358_s20 }
  0x1c   : > { %p367_p3 = por %p366_p2, %p365_p1 }
  0x1e   : > { %p368_p5 = pnand %p367_p3, %p361_p0 }
  0x94   : > { %v186_v3 = vpop.permute.xlu0 %185 }
  0x95   : > { %v188_v4 = vmul.f32 %v186_v3, %v181_v2 }
  0x97   : > { %190 = vst.msk [vmem:[%s169_s6] sm:$0xf] %vm189_vm0, %v188_v4 }
  0x98   : > { %371 = shalt.err (!%p368_p5)
}
  0x99   : > { %s372_s25 = scalar_lea.hbm %s204_s16, 64  ;;  %s376_s28 = scalar_lea.hbm %s557_s2, 128 }
  0x9a   : > { %p373_p6 = scmp.ne.s32.totalorder %s204_s16, %s372_s25  ;;  %p377_p10 = scmp.lt.s32.totalorder %s204_s16, %s557_s2 }
  0x9b   : > { %p378_p11 = scmp.lt.s32.totalorder %s376_s28, %s372_s25 }
  0x9c   : > { %p374_p7 = pnand %p373_p6, %p493_p4 }
  0x9d   : > { %p379_p12 = por %p378_p11, %p377_p10 }
  0x9e   : > { %p375_p9 = pneg %p374_p7 }
  0xa0   : > { %p380_p13 = pnand %p379_p12, %p375_p9 }
  0xa2   : > { %383 = shalt.err (!%p380_p13)
}
  0xa3   : > { %301 = dma.vmem_to_hbm [thread:$0]  (%p493_p4), %s207_s7, 64, %s204_s16, %s192_s18  }
  0xa4 PF: > { %p307_p0 = scmp.ge.s32.totalorder %s434_s14, 2  ;;  %s218_s3 = sand.u32 1, %s414_s9  }
  0xa5   : > { %s219_s4 = scalar_lea.sflag [#allocation3], %s218_s3 }
  0xa6   : > { %p304_p1 = pnand %p307_p0, %p500_p8 }
  0xa8   : > { %p305_p2 = pneg %p304_p1 }
  0xaa   : > { %409 = dma.done.wait (%p305_p2), %s219_s4, 64  }
  0xab   : > { %411 = vsyncadd (%p305_p2), %s219_s4, 4294967232  ;;  %s15_s14 = sadd.s32 1, %s434_s14   ;;  %s560_s9 = smov %s418_s10 }
  0xac   : > { %p12_p3 = scmp.ge.s32.totalorder %s15_s14, 4   ;;  %s561_s10 = smov %s422_s11 }
  0xad   : > { %s562_s11 = smov %s506_s22  ;;  %s563_s12 = smov %s430_s13 }
  0xae   : > { %s564_s13 = smov %s566_s17  ;;  %14 = sbr.rel (!%p12_p3) target bundleno = 4 (0x4), region = 66 }
  0xb3   :  { %224 = vsyncpa [#allocation3], 1 }
  0xb4   :  { %226 = vsyncpa [#allocation3 + $0x1], 1 }

</bundles_post_ra>
